<compile_context>
chip_gen: v5e
topology: v5e:2x2
jax: 0.10.0
libtpu: 0.0.40
codegen_flags: <defaults>
</compile_context>

<pallas_src>
import jax
import jax.numpy as jnp
from jax.experimental import pallas as pl
from jax.experimental.pallas import tpu as pltpu

EPS = 1e-4


# ----------------------------------------------------------------------------- kernel
def _bifpn_add2_kernel(w_ref, x0_ref, x1_ref, cw_ref, b_ref, o_ref):
    # w_ref : (2,)      f32 SMEM   raw (unnormalized) fusion weights (scalar prefetch)
    # x0_ref: (C1, T)   VMEM       activation tile, native dtype (f32 or bf16)
    # x1_ref: (C1, T)   VMEM
    # cw_ref: (C2, C1)  VMEM       1x1 conv weight (resident; f32, or bf16 when C>=128)
    # b_ref : (C2, 1)   f32 VMEM   conv bias
    # o_ref : (C2, T)   VMEM       output tile (spatial axis = lanes)
    w0 = w_ref[0]
    w1 = w_ref[1]
    inv = 1.0 / (w0 + w1 + EPS)
    a = (w0 * inv) * x0_ref[...].astype(jnp.float32) \
        + (w1 * inv) * x1_ref[...].astype(jnp.float32)
    s = a * jax.nn.sigmoid(a)                 # SiLU in f32 (v5e: no bf16 VPU/EUP)
    # cw dtype is chosen by the wrapper (bf16 iff C1,C2 >= 128); accumulate in f32.
    y = jnp.dot(cw_ref[...], s.astype(cw_ref.dtype),
                preferred_element_type=jnp.float32)
    y = y + b_ref[...]
    o_ref[...] = y.astype(o_ref.dtype)


# ----------------------------------------------------------------------------- sizing
def _tpu_vmem_params():
    """Generation-aware (vmem_limit_bytes, tile_budget_bytes, prefer_even_steps)."""
    kind = ""
    try:
        kind = jax.devices()[0].device_kind.lower()
    except Exception:
        pass
    is_v7 = ("v7" in kind) or ("tpu7" in kind) or ("7x" in kind)
    if is_v7:
        # 64 MiB physical VMEM shared by 2 TensorCores: stay conservative.
        return 44 * 1024 * 1024, 24 * 1024 * 1024, True
    if ("v5" in kind) or ("v6" in kind):
        # 128 MiB physical; scoped default is only 16/32 MiB, so raise it and
        # spend the headroom on larger spatial tiles.
        return 96 * 1024 * 1024, 56 * 1024 * 1024, False
    # Unknown generation: v7x-safe defaults.
    return 40 * 1024 * 1024, 20 * 1024 * 1024, True


def _pick_spatial_tile(hw_pad, n, c1, c2, in_bytes, out_bytes, budget_bytes,
                       *, min_steps=4, prefer_even_steps=False):
    """Largest multiple of 128 dividing hw_pad whose full VMEM footprint
    (double-buffered I/O + resident weights + f32 in-kernel intermediates)
    fits the budget, preferring >=min_steps grid steps (even on v7x) and a
    >=512-lane tile floor."""
    assert hw_pad % 128 == 0

    def footprint(t):
        io = 4 * c1 * t * in_bytes + 2 * c2 * t * out_bytes   # 2 inputs + out, x2 buffers
        resident = 2 * (c1 * c2 + c2) * 4                     # conv weight/bias (x2 worst case)
        interm = 3 * c1 * t * 4 + c2 * t * 4                  # f32 upcasts, a/s, y scratch
        return io + resident + interm

    cands = [t for t in range(128, hw_pad + 1, 128) if hw_pad % t == 0]
    feasible = [t for t in cands if footprint(t) <= budget_bytes] or [128]
    lane_floor = min(512, hw_pad)

    def rank(t):
        steps = n * (hw_pad // t)
        ok_steps = steps >= min_steps
        if prefer_even_steps:
            ok_steps = ok_steps and (steps % 2 == 0)
        return (ok_steps, t >= lane_floor, t)

    return max(feasible, key=rank)


# ----------------------------------------------------------------------------- wrapper
def bifpn_add2(x0_nchw, x1_nchw, w, conv_w, conv_b, *,
               out_dtype=None, vmem_limit_bytes=None):
    """x0_nchw, x1_nchw: (N, C1, H, W) in their native dtype (f32 or bf16 --
    they are NOT converted here); w: (2,) f32; conv_w: (C2, C1, 1, 1) f32;
    conv_b: (C2,) f32.  Returns (N, C2, H, W) in out_dtype (default: x0 dtype)."""
    N, C1, H, W = x0_nchw.shape
    C2 = conv_w.shape[0]
    HW = H * W
    if out_dtype is None:
        out_dtype = x0_nchw.dtype

    limit, budget, prefer_even = _tpu_vmem_params()
    if vmem_limit_bytes is not None:
        limit = vmem_limit_bytes
        budget = int(0.55 * vmem_limit_bytes)

    # Free (contiguous) reshapes -- no transpose / convert passes over HBM.
    x0 = x0_nchw.reshape(N, C1, HW)
    x1 = x1_nchw.reshape(N, C1, HW)

    # Lane-dense slab: pad the flattened spatial axis up to a multiple of 128 so
    # stores are always unmasked vst (masked lane-sparse stores ~4.5x slower).
    HW_pad = ((HW + 127) // 128) * 128
    if HW_pad != HW:
        pad = HW_pad - HW
        x0 = jnp.pad(x0, ((0, 0), (0, 0), (0, pad)))
        x1 = jnp.pad(x1, ((0, 0), (0, 0), (0, pad)))

    in_bytes = max(jnp.dtype(x0.dtype).itemsize, jnp.dtype(x1.dtype).itemsize)
    out_bytes = jnp.dtype(out_dtype).itemsize
    T = _pick_spatial_tile(HW_pad, N, C1, C2, in_bytes, out_bytes, budget,
                           min_steps=4, prefer_even_steps=prefer_even)
    grid = (N, HW_pad // T)

    # 1x1 conv params.  MXU operands go bf16 only when both C dims are MXU-sized.
    mxu_dtype = jnp.bfloat16 if (C1 >= 128 and C2 >= 128) else jnp.float32
    cw = conv_w.reshape(C2, C1).astype(mxu_dtype)
    cb = conv_b.reshape(C2, 1).astype(jnp.float32)
    wf = w.astype(jnp.float32)

    def run(single_buffer_weights):
        # Resident (constant-index-map) inputs: reclaim the revolving second
        # buffer when the runtime supports single-buffering.
        wb = dict(pipeline_mode=pl.Buffered(1)) if single_buffer_weights else {}
        out = pl.pallas_call(
            _bifpn_add2_kernel,
            out_shape=jax.ShapeDtypeStruct((N, C2, HW_pad), out_dtype),
            grid_spec=pltpu.PrefetchScalarGridSpec(
                num_scalar_prefetch=1,                               # w -> SMEM
                grid=grid,
                in_specs=[
                    pl.BlockSpec((None, C1, T), lambda n, s, w_: (n, 0, s)),   # x0 tile
                    pl.BlockSpec((None, C1, T), lambda n, s, w_: (n, 0, s)),   # x1 tile
                    pl.BlockSpec((C2, C1), lambda n, s, w_: (0, 0), **wb),     # conv weight
                    pl.BlockSpec((C2, 1), lambda n, s, w_: (0, 0), **wb),      # conv bias
                ],
                out_specs=pl.BlockSpec((None, C2, T), lambda n, s, w_: (n, 0, s)),
            ),
            compiler_params=pltpu.CompilerParams(
                dimension_semantics=("parallel", "parallel"),
                vmem_limit_bytes=limit,
            ),
        )(wf, x0, x1, cw, cb)
        return jax.block_until_ready(out)

    # Buffered(1) is a pure VMEM-reclaim optimization; fall back if the
    # installed Pallas/Mosaic rejects it.  (Eager path; under jit the default
    # double-buffered specs are used unconditionally by passing False.)
    try:
        out = run(True)
    except Exception:
        out = run(False)

    if HW_pad != HW:
        out = out[:, :, :HW]
    return out.reshape(N, C2, H, W)


# ----------------------------------------------------------------------------- reference
def reference(x0, x1, w, conv_w, conv_b):
    weight = w / (jnp.sum(w) + EPS)
    a = weight[0] * x0 + weight[1] * x1
    s = a * jax.nn.sigmoid(a)
    y = jnp.einsum("nchw,oc->nohw", s, conv_w.reshape(conv_w.shape[0], -1),
                   precision=jax.lax.Precision.HIGHEST)
    return y + conv_b.reshape(1, -1, 1, 1)


if __name__ == "__main__":
    key = jax.random.PRNGKey(0)
    k0, k1, k2, k3 = jax.random.split(key, 4)

    N, C1, C2, H, W = 2, 4, 4, 16, 16

    x0 = jax.random.normal(k0, (N, C1, H, W), dtype=jnp.float32)
    x1 = jax.random.normal(k1, (N, C1, H, W), dtype=jnp.float32)

    # Parameters (deterministic init; matches module shapes).
    w = jnp.ones((2,), dtype=jnp.float32)                     # nn.Parameter(torch.ones(2))
    conv_w = 0.1 * jax.random.normal(k2, (C2, C1, 1, 1), dtype=jnp.float32)
    conv_b = 0.1 * jax.random.normal(k3, (C2,), dtype=jnp.float32)

    # f32 path (faithful to the PyTorch module: f32 SiLU, f32 accumulation).
    y_ref = reference(x0, x1, w, conv_w, conv_b)
    y = bifpn_add2(x0, x1, w, conv_w, conv_b)
    jax.block_until_ready(y)
    assert y.shape == (N, C2, H, W)
    assert jnp.allclose(y, y_ref, atol=1e-4, rtol=1e-4), "f32 mismatch vs reference"

    # Odd spatial size (H*W = 100, not a multiple of 128) -> exercises the
    # pad-to-128 lane-dense path instead of masked stores.
    Ho = Wo = 10
    x0o = jax.random.normal(k0, (N, C1, Ho, Wo), dtype=jnp.float32)
    x1o = jax.random.normal(k1, (N, C1, Ho, Wo), dtype=jnp.float32)
    y_o = bifpn_add2(x0o, x1o, w, conv_w, conv_b)
    jax.block_until_ready(y_o)
    assert y_o.shape == (N, C2, Ho, Wo)
    assert jnp.allclose(y_o, reference(x0o, x1o, w, conv_w, conv_b),
                        atol=1e-4, rtol=1e-4), "padded-spatial mismatch vs reference"

    # bf16 streaming path: the CALLER hands bf16 activations (no wrapper-side
    # convert pass) and asks for bf16 output; SiLU/matmul still accumulate in
    # f32 inside the kernel.  Note: inputs are truncated to bf16 upstream of
    # the weighted add, hence the looser tolerance.
    y_bf16 = bifpn_add2(x0.astype(jnp.bfloat16), x1.astype(jnp.bfloat16),
                        w, conv_w, conv_b, out_dtype=jnp.bfloat16)
    jax.block_until_ready(y_bf16)
    assert jnp.allclose(y_bf16.astype(jnp.float32), y_ref, atol=5e-2, rtol=5e-2), \
        "bf16 mismatch vs reference"

    print("KERNEL_OK")
</pallas_src>

<mosaic_0001>
module attributes {stable_mosaic.version = 11 : i64} {
  func.func @_bifpn_add2_kernel(%arg0: i32, %arg1: i32, %arg2: memref<2xf32, #tpu.memory_space<smem>>, %arg3: memref<1x4x128xf32, #tpu.memory_space<vmem>>, %arg4: memref<1x4x128xf32, #tpu.memory_space<vmem>>, %arg5: memref<4x4xf32, #tpu.memory_space<vmem>>, %arg6: memref<4x1xf32, #tpu.memory_space<vmem>>, %arg7: memref<1x4x128xf32, #tpu.memory_space<vmem>>) attributes {dimension_semantics = [#tpu.dimension_semantics<parallel>, #tpu.dimension_semantics<parallel>], iteration_bounds = array<i64: 2, 2>, scalar_prefetch = 1 : i64, scratch_operands = 0 : i64, tpu.core_type = #tpu.core_type<tc>, window_params = [{transform_indices = @transform_0, window_bounds = array<i64: 1, 4, 128>}, {transform_indices = @transform_1, window_bounds = array<i64: 1, 4, 128>}, {pipeline_mode = #tpu.pipeline_mode<synchronous>, transform_indices = @transform_2, window_bounds = array<i64: 4, 4>}, {pipeline_mode = #tpu.pipeline_mode<synchronous>, transform_indices = @transform_3, window_bounds = array<i64: 4, 1>}, {transform_indices = @transform_4, window_bounds = array<i64: 1, 4, 128>}]} {
    %c0 = arith.constant 0 : index
    %0 = memref.load %arg2[%c0] : memref<2xf32, #tpu.memory_space<smem>>
    %c1 = arith.constant 1 : index
    %1 = memref.load %arg2[%c1] : memref<2xf32, #tpu.memory_space<smem>>
    %2 = arith.addf %0, %1 : f32
    %cst = arith.constant 9.99999974E-5 : f32
    %3 = arith.addf %2, %cst : f32
    %cst_0 = arith.constant 1.000000e+00 : f32
    %4 = arith.divf %cst_0, %3 : f32
    %5 = arith.mulf %0, %4 : f32
    %c0_1 = arith.constant 0 : index
    %c0_2 = arith.constant 0 : index
    %c0_3 = arith.constant 0 : index
    %6 = vector.load %arg3[%c0_1, %c0_2, %c0_3] : memref<1x4x128xf32, #tpu.memory_space<vmem>>, vector<1x4x128xf32>
    %7 = vector.shape_cast %6 : vector<1x4x128xf32> to vector<4x128xf32>
    %8 = vector.broadcast %5 : f32 to vector<4x128xf32>
    %9 = arith.mulf %8, %7 : vector<4x128xf32>
    %10 = arith.mulf %1, %4 : f32
    %c0_4 = arith.constant 0 : index
    %c0_5 = arith.constant 0 : index
    %c0_6 = arith.constant 0 : index
    %11 = vector.load %arg4[%c0_4, %c0_5, %c0_6] : memref<1x4x128xf32, #tpu.memory_space<vmem>>, vector<1x4x128xf32>
    %12 = vector.shape_cast %11 : vector<1x4x128xf32> to vector<4x128xf32>
    %13 = vector.broadcast %10 : f32 to vector<4x128xf32>
    %14 = arith.mulf %13, %12 : vector<4x128xf32>
    %15 = arith.addf %9, %14 : vector<4x128xf32>
    %16 = arith.negf %15 : vector<4x128xf32>
    %17 = math.exp %16 : vector<4x128xf32>
    %cst_7 = arith.constant 1.000000e+00 : f32
    %18 = vector.broadcast %cst_7 : f32 to vector<4x128xf32>
    %19 = arith.addf %18, %17 : vector<4x128xf32>
    %20 = arith.divf %18, %19 : vector<4x128xf32>
    %21 = arith.mulf %15, %20 : vector<4x128xf32>
    %c0_8 = arith.constant 0 : index
    %c0_9 = arith.constant 0 : index
    %22 = vector.load %arg5[%c0_8, %c0_9] : memref<4x4xf32, #tpu.memory_space<vmem>>, vector<4x4xf32>
    %cst_10 = arith.constant dense<0.000000e+00> : vector<4x128xf32>
    %23 = tpu.matmul %22, %21, %cst_10 {dimension_numbers = #tpu.dot_dimension_numbers<[1], [0], [0], [1], [0, 0, 1, 1], [], []>} : vector<4x4xf32>, vector<4x128xf32>, vector<4x128xf32> -> vector<4x128xf32>
    %c0_11 = arith.constant 0 : index
    %c0_12 = arith.constant 0 : index
    %24 = vector.load %arg6[%c0_11, %c0_12] : memref<4x1xf32, #tpu.memory_space<vmem>>, vector<4x1xf32>
    %25 = vector.broadcast %24 : vector<4x1xf32> to vector<4x128xf32>
    %26 = arith.addf %23, %25 : vector<4x128xf32>
    %c0_13 = arith.constant 0 : index
    %c0_14 = arith.constant 0 : index
    %c0_15 = arith.constant 0 : index
    %27 = vector.load %arg7[%c0_13, %c0_14, %c0_15] : memref<1x4x128xf32, #tpu.memory_space<vmem>>, vector<1x4x128xf32>
    %28 = vector.shape_cast %27 : vector<1x4x128xf32> to vector<4x128xf32>
    %29 = vector.shape_cast %26 : vector<4x128xf32> to vector<1x4x128xf32>
    tpu.vector_store %arg7[%c0_13, %c0_14, %c0_15], %29 {strides = array<i32>} : memref<1x4x128xf32, #tpu.memory_space<vmem>>, vector<1x4x128xf32>,
    return
  }
  func.func @transform_0(%arg0: i32, %arg1: i32, %arg2: memref<2xf32, #tpu.memory_space<smem>>) -> (i32, i32, i32) {
    %c0_i32 = arith.constant 0 : i32
    %c0_i32_0 = arith.constant 0 : i32
    return %arg0, %c0_i32, %arg1 : i32, i32, i32
  }
  func.func @transform_1(%arg0: i32, %arg1: i32, %arg2: memref<2xf32, #tpu.memory_space<smem>>) -> (i32, i32, i32) {
    %c0_i32 = arith.constant 0 : i32
    %c0_i32_0 = arith.constant 0 : i32
    return %arg0, %c0_i32, %arg1 : i32, i32, i32
  }
  func.func @transform_2(%arg0: i32, %arg1: i32, %arg2: memref<2xf32, #tpu.memory_space<smem>>) -> (i32, i32) {
    %c0_i32 = arith.constant 0 : i32
    %c0_i32_0 = arith.constant 0 : i32
    %c0_i32_1 = arith.constant 0 : i32
    return %c0_i32, %c0_i32_0 : i32, i32
  }
  func.func @transform_3(%arg0: i32, %arg1: i32, %arg2: memref<2xf32, #tpu.memory_space<smem>>) -> (i32, i32) {
    %c0_i32 = arith.constant 0 : i32
    %c0_i32_0 = arith.constant 0 : i32
    %c0_i32_1 = arith.constant 0 : i32
    return %c0_i32, %c0_i32_0 : i32, i32
  }
  func.func @transform_4(%arg0: i32, %arg1: i32, %arg2: memref<2xf32, #tpu.memory_space<smem>>) -> (i32, i32, i32) {
    %c0_i32 = arith.constant 0 : i32
    %c0_i32_0 = arith.constant 0 : i32
    return %arg0, %c0_i32, %arg1 : i32, i32, i32
  }
}

module attributes {stable_mosaic.version = 11 : i64} {
  func.func @_bifpn_add2_kernel(%arg0: i32, %arg1: i32, %arg2: memref<2xf32, #tpu.memory_space<smem>>, %arg3: memref<1x4x128xf32, #tpu.memory_space<vmem>>, %arg4: memref<1x4x128xf32, #tpu.memory_space<vmem>>, %arg5: memref<4x4xf32, #tpu.memory_space<vmem>>, %arg6: memref<4x1xf32, #tpu.memory_space<vmem>>, %arg7: memref<1x4x128xf32, #tpu.memory_space<vmem>>) attributes {dimension_semantics = [#tpu.dimension_semantics<parallel>, #tpu.dimension_semantics<parallel>], iteration_bounds = array<i64: 2, 2>, scalar_prefetch = 1 : i64, scratch_operands = 0 : i64, tpu.core_type = #tpu.core_type<tc>, window_params = [{transform_indices = @transform_0, window_bounds = array<i64: 1, 4, 128>}, {transform_indices = @transform_1, window_bounds = array<i64: 1, 4, 128>}, {pipeline_mode = #tpu.pipeline_mode<synchronous>, transform_indices = @transform_2, window_bounds = array<i64: 4, 4>}, {pipeline_mode = #tpu.pipeline_mode<synchronous>, transform_indices = @transform_3, window_bounds = array<i64: 4, 1>}, {transform_indices = @transform_4, window_bounds = array<i64: 1, 4, 128>}]} {
    %c0 = arith.constant 0 : index
    %0 = memref.load %arg2[%c0] : memref<2xf32, #tpu.memory_space<smem>>
    %c1 = arith.constant 1 : index
    %1 = memref.load %arg2[%c1] : memref<2xf32, #tpu.memory_space<smem>>
    %2 = arith.addf %0, %1 : f32
    %cst = arith.constant 9.99999974E-5 : f32
    %3 = arith.addf %2, %cst : f32
    %cst_0 = arith.constant 1.000000e+00 : f32
    %4 = arith.divf %cst_0, %3 : f32
    %5 = arith.mulf %0, %4 : f32
    %c0_1 = arith.constant 0 : index
    %c0_2 = arith.constant 0 : index
    %c0_3 = arith.constant 0 : index
    %6 = vector.load %arg3[%c0_1, %c0_2, %c0_3] : memref<1x4x128xf32, #tpu.memory_space<vmem>>, vector<1x4x128xf32>
    %7 = vector.shape_cast %6 : vector<1x4x128xf32> to vector<4x128xf32>
    %8 = vector.broadcast %5 : f32 to vector<4x128xf32>
    %9 = arith.mulf %8, %7 : vector<4x128xf32>
    %10 = arith.mulf %1, %4 : f32
    %c0_4 = arith.constant 0 : index
    %c0_5 = arith.constant 0 : index
    %c0_6 = arith.constant 0 : index
    %11 = vector.load %arg4[%c0_4, %c0_5, %c0_6] : memref<1x4x128xf32, #tpu.memory_space<vmem>>, vector<1x4x128xf32>
    %12 = vector.shape_cast %11 : vector<1x4x128xf32> to vector<4x128xf32>
    %13 = vector.broadcast %10 : f32 to vector<4x128xf32>
    %14 = arith.mulf %13, %12 : vector<4x128xf32>
    %15 = arith.addf %9, %14 : vector<4x128xf32>
    %16 = arith.negf %15 : vector<4x128xf32>
    %17 = math.exp %16 : vector<4x128xf32>
    %cst_7 = arith.constant 1.000000e+00 : f32
    %18 = vector.broadcast %cst_7 : f32 to vector<4x128xf32>
    %19 = arith.addf %18, %17 : vector<4x128xf32>
    %20 = arith.divf %18, %19 : vector<4x128xf32>
    %21 = arith.mulf %15, %20 : vector<4x128xf32>
    %c0_8 = arith.constant 0 : index
    %c0_9 = arith.constant 0 : index
    %22 = vector.load %arg5[%c0_8, %c0_9] : memref<4x4xf32, #tpu.memory_space<vmem>>, vector<4x4xf32>
    %cst_10 = arith.constant dense<0.000000e+00> : vector<4x128xf32>
    %23 = tpu.matmul %22, %21, %cst_10 {dimension_numbers = #tpu.dot_dimension_numbers<[1], [0], [0], [1], [0, 0, 1, 1], [], []>} : vector<4x4xf32>, vector<4x128xf32>, vector<4x128xf32> -> vector<4x128xf32>
    %c0_11 = arith.constant 0 : index
    %c0_12 = arith.constant 0 : index
    %24 = vector.load %arg6[%c0_11, %c0_12] : memref<4x1xf32, #tpu.memory_space<vmem>>, vector<4x1xf32>
    %25 = vector.broadcast %24 : vector<4x1xf32> to vector<4x128xf32>
    %26 = arith.addf %23, %25 : vector<4x128xf32>
    %c0_13 = arith.constant 0 : index
    %c0_14 = arith.constant 0 : index
    %c0_15 = arith.constant 0 : index
    %27 = vector.load %arg7[%c0_13, %c0_14, %c0_15] : memref<1x4x128xf32, #tpu.memory_space<vmem>>, vector<1x4x128xf32>
    %28 = vector.shape_cast %27 : vector<1x4x128xf32> to vector<4x128xf32>
    %29 = vector.shape_cast %26 : vector<4x128xf32> to vector<1x4x128xf32>
    tpu.vector_store %arg7[%c0_13, %c0_14, %c0_15], %29 {strides = array<i32>} : memref<1x4x128xf32, #tpu.memory_space<vmem>>, vector<1x4x128xf32>,
    return
  }
  func.func @transform_0(%arg0: i32, %arg1: i32, %arg2: memref<2xf32, #tpu.memory_space<smem>>) -> (i32, i32, i32) {
    %c0_i32 = arith.constant 0 : i32
    %c0_i32_0 = arith.constant 0 : i32
    return %arg0, %c0_i32, %arg1 : i32, i32, i32
  }
  func.func @transform_1(%arg0: i32, %arg1: i32, %arg2: memref<2xf32, #tpu.memory_space<smem>>) -> (i32, i32, i32) {
    %c0_i32 = arith.constant 0 : i32
    %c0_i32_0 = arith.constant 0 : i32
    return %arg0, %c0_i32, %arg1 : i32, i32, i32
  }
  func.func @transform_2(%arg0: i32, %arg1: i32, %arg2: memref<2xf32, #tpu.memory_space<smem>>) -> (i32, i32) {
    %c0_i32 = arith.constant 0 : i32
    %c0_i32_0 = arith.constant 0 : i32
    %c0_i32_1 = arith.constant 0 : i32
    return %c0_i32, %c0_i32_0 : i32, i32
  }
  func.func @transform_3(%arg0: i32, %arg1: i32, %arg2: memref<2xf32, #tpu.memory_space<smem>>) -> (i32, i32) {
    %c0_i32 = arith.constant 0 : i32
    %c0_i32_0 = arith.constant 0 : i32
    %c0_i32_1 = arith.constant 0 : i32
    return %c0_i32, %c0_i32_0 : i32, i32
  }
  func.func @transform_4(%arg0: i32, %arg1: i32, %arg2: memref<2xf32, #tpu.memory_space<smem>>) -> (i32, i32, i32) {
    %c0_i32 = arith.constant 0 : i32
    %c0_i32_0 = arith.constant 0 : i32
    return %arg0, %c0_i32, %arg1 : i32, i32, i32
  }
}

</mosaic_0001>

<bundles_post_ra>
// kernel: tpu_custom_call.1
= control target key start
LH: loop header
LB: loop body
LE: loop exit
PB: predicated region body
PF: predicated region fallthrough
CT: control target
= control target key end

     0   :  { %s793_s21 = smov [#allocation3]   ;;  %s999_s0 = inlined_call_operand.vmem [shape: f32[2], index: 0, kind: input, shape index: {}]   ;;  %s1000_s1 = inlined_call_operand.hbm [shape: f32[2,4,256], index: 1, kind: input, shape index: {}]   ;;  %s1001_s2 = inlined_call_operand.hbm [shape: f32[2,4,256], index: 2, kind: input, shape index: {}]   ;;  %s1002_s3 = inlined_call_operand.vmem [shape: f32[4,4], index: 3, kind: input, shape index: {}]   ;;  %s1003_s4 = inlined_call_operand.vmem [shape: f32[4,1], index: 4, kind: input, shape index: {}]   ;;  %s1004_s5 = inlined_call_operand.hbm [shape: f32[2,4,256], index: 5, kind: output, shape index: {}]  }
   0x1   :  { %1007 = sst [smem:[#allocation16_spill]] %s1000_s1  ;;  %s11_s20 = sshll.u32 %s999_s0, 4  ;;  %s12_s20 = int_to_ptr.vmem [resolvable:$true] %s11_s20 }
   0x2   :  { %14 = dma.vmem_to_smem %s12_s20, 16, %s793_s21, [#allocation2] }
   0x3   :  { %747 = dma.done.wait [#allocation2], 16 }
   0x4   :  { %748 = vsyncadd [#allocation2], 4294967280 }
   0x5   :  { %17 = sfence }
   0x6   :  { %18 = vsyncpa [#allocation5], 0 }
   0x7   :  { %20 = vsyncpa [#allocation5 + $0x1], 0 }
   0x8   :  { %21 = vsyncpa [#allocation8], 0 }
   0x9   :  { %23 = vsyncpa [#allocation8 + $0x1], 0 }
   0xa   :  { %24 = vsyncpa [#allocation6], 0 }
   0xb   :  { %26 = vsyncpa [#allocation6 + $0x1], 0  ;;  %s828_s22 = smov 0   ;;  %s830_s23 = smov 0  }
   0xc   :  { %s832_s24 = smov 0   ;;  %s834_s25 = smov 0  }
   0xd   :  { %s836_s0 = smov 0   ;;  %s838_s26 = smov 0  }
   0xe   :  { %s840_s27 = smov 0   ;;  %s842_s28 = smov 0  }
   0xf LB: > { %s498_s29 = sadd.s32 4294967295, %s791_s28   ;;  %s499_s30 = sadd.s32 4294967294, %s791_s28   ;;  %s791_s28 = sphi %s842_s28, %s32_s28   ;;  %s787_s27 = sphi %s840_s27, %s1024_s27   ;;  %s783_s26 = sphi %s838_s26, %s1023_s26   ;;  %s779_s0 = sphi %s836_s0, %s1022_s0   ;;  %s775_s25 = sphi %s834_s25, %s1021_s25   ;;  %s771_s24 = sphi %s832_s24, %s1020_s24   ;;  %s767_s23 = sphi %s830_s23, %s1019_s23   ;;  %s763_s22 = sphi %s828_s22, %s1018_s22  }
  0x10   : > { %s41_s6 = sadd.s32 1, %s783_s26  ;;  %s44_s7 = sadd.s32 1, %s787_s27 }
  0x11   : > { %p42_p0 = scmp.ge.s32.totalorder %s41_s6, 2  ;;  %s53_s8 = sadd.s32 1, %s771_s24 }
  0x12   : > { %p60_p1 = scmp.ne.s32.totalorder %s771_s24, %s767_s23  ;;  %p61_p2 = scmp.eq.s32.totalorder %s791_s28, 0 }
  0x13   : > { %s1026_s6 = smov (%p42_p0, %s41_s6), 0  ;;  %s1028_s7 = smov (!%p42_p0, %s44_s7), %s787_s27 }
  0x14   : > { %1008 = sst [smem:[#allocation14_spill]] %s1026_s6  ;;  %s49_s9 = ssub.s32 %s783_s26, %s1026_s6 }
  0x15   : > { %p881_p3 = por %p61_p2, %p60_p1  ;;  %p46_p4 = scmp.ge.s32.totalorder %s1028_s7, 2 }
  0x16   : > { %p66_p5 = scmp.ne.s32.totalorder %s767_s23, %s763_s22  ;;  %p67_p6 = scmp.eq.s32.totalorder %s498_s29, 0 }
  0x17   : > { %p162_p7 = scmp.eq.s32.totalorder %s498_s29, 3  ;;  %s1030_s7 = smov (%p46_p4, %s1028_s7), 0 }
  0x18   : > { %1010 = sst [smem:[#allocation15_spill]] %s1030_s7  ;;  %p889_p8 = por %p67_p6, %p66_p5 }
  0x19   : > { %p893_p9 = por %p162_p7, %p60_p1  ;;  %s48_s13 = ssub.s32 %s787_s27, %s1030_s7 }
  0x1a   : > { %p168_p10 = scmp.eq.s32.totalorder %s499_s30, 3  ;;  %s50_s14 = sor.u32 %s49_s9, %s48_s13 }
  0x1b   : > { %p51_p11 = scmp.eq.s32.totalorder %s50_s14, 0  ;;  %p540_p13 = scmp.lt.s32.totalorder %s791_s28, 4 }
  0x1c   : > { %p899_p12 = por %p168_p10, %p66_p5  ;;  %s194_s16 = sand.u32 1, %s771_s24  }
  0x1d   : > { %s906_s17 = scalar_select %p51_p11, %s771_s24, %s53_s8  }
  0x1e   : > { %s502_s18 = sshll.u32 %s194_s16, 2  ;;  %s503_s19 = sshll.u32 %s787_s27, 1 }
  0x1f   : > { %s202_s20 = sadd.s32 %s783_s26, %s503_s19  ;;  %s198_s21 = scalar_lea.vmem [#allocation4], %s502_s18 }
  0x20   : > { %s208_s29 = sshll.u32 %s198_s21, 4  ;;  %s504_s7 = sshll.u32 %s202_s20, 2  ;;  %s209_s29 = int_to_ptr.vmem [resolvable:$true] %s208_s29 }
  0x21   : > { %s1014_s1 = sld [smem:[#allocation16_spill]]  ;;  %p915_p0 = pnand %p540_p13, %p881_p3 }
  0x22   : > { %p508_p1 = scmp.ge.s32.totalorder %s791_s28, 1  ;;  %s195_s6 = scalar_lea.sflag [#allocation5], %s194_s16 }
  0x23   : > { %p234_p2 = scmp.lt.s32.totalorder %s791_s28, 5  ;;  %s225_s21 = scalar_lea.hbm %s1001_s2, %s504_s7 }
  0x24   : > { %s227_s30 = sshll.u32 %s225_s21, 4  ;;  %s219_s10 = scalar_lea.vmem [#allocation7], %s502_s18  ;;  %s228_s30 = int_to_ptr.hbm [resolvable:$true] %s227_s30 }
  0x25   : > { %p235_p4 = pnand %p508_p1, %p234_p2  ;;  %s229_s9 = sshll.u32 %s219_s10, 4  ;;  %s230_s9 = int_to_ptr.vmem [resolvable:$true] %s229_s9 }
  0x27   : > { %s204_s13 = scalar_lea.hbm %s1014_s1, %s504_s7  ;;  %s216_s1 = scalar_lea.sflag [#allocation8], %s194_s16 }
  0x28   : > { %s206_s8 = sshll.u32 %s204_s13, 4  ;;  %238 = sbr.rel (%p235_p4) target bundleno = 298 (0x12a), region = 36  ;;  %s207_s8 = int_to_ptr.hbm [resolvable:$true] %s206_s8 }
  0x29   : > { %532 = dma.hbm_to_vmem [thread:$0]  (!%p915_p0), %s207_s8, 64, %s209_s29, %s195_s6  }
  0x2a   : > { %535 = dma.hbm_to_vmem [thread:$0]  (!%p915_p0), %s228_s30, 64, %s230_s9, %s216_s1  }
  0x2b   : > { %s929_s13 = sand.u32 (!%p235_p4), 1, %s767_s23  }
  0x2c   : > { %s932_s6 = sshll.u32 (!%p235_p4), %s929_s13, 2  ;;  %s241_s7 = scalar_lea.sflag (!%p235_p4), [#allocation5], %s929_s13 }
  0x2d   : > { %s244_s29 = scalar_lea.vmem [#allocation4], %s932_s6 }
  0x2e   : > { %750 = dma.done.wait (%p889_p8), %s241_s7, 64  }
  0x2f   : > { %752 = vsyncadd (%p889_p8), %s241_s7, 4294967232  ;;  %s251_s1 = scalar_lea.sflag [#allocation8], %s929_s13  ;;  %s254_s16 = scalar_lea.vmem [#allocation7], %s932_s6 }
  0x30   : > { %754 = dma.done.wait (%p889_p8), %s251_s1, 64  }
  0x31   : > { %756 = vsyncadd (%p889_p8), %s251_s1, 4294967232  ;;  %s285_s18 = sld [smem:[#allocation3]]  ;;  %v306_v11 = vld [vmem:[%s244_s29] sm:$0xf]  ;;  %v310_v12 = vld [vmem:[%s254_s16] sm:$0xf] }
  0x32   : > { %s512_s14 = sld [smem:[#allocation3 + $0x1]]  ;;  %v335_v18 = vld [vmem:[%s1003_s4] sm:$0xf]  ;;  %v794_v20 = vmov 0   ;;  %vm345_vm8 = vcmask 1043456   ;;  %vm341_vm9 = vcmask 31744  }
  0x33   : > { %608 = vset.pattern.permute.xlu0 %v794_v20  ;;  %v334_v34 = vld [vmem:[%s1002_s3] sm:$0xf]  ;;  %s517_s29 = sshll.u32 %s779_s0, 1  ;;  %s707_s9 = scalar_lea.hbm %s1004_s5, 16 }
  0x34   : > { %338 = vperm.xlu0 %608, %v335_v18   ;;  %s381_s1 = sadd.s32 %s775_s25, %s517_s29 }
  0x35   : > { %s518_s16 = sshll.u32 %s381_s1, 2 }
  0x38   : > { %s287_s8 = sadd.f32 %s512_s14, %s285_s18 }
  0x3a   : > { %s288_s19 = sadd.f32 0.0001, %s287_s8  ;;  %s383_s8 = scalar_lea.hbm %s1004_s5, %s518_s16 }
  0x3c   : > { %v289_v0 = vstv %s288_s19  ;;  %s284_s19 = scalar_lea.vmem [#allocation9], %s932_s6 }
  0x3d   : > { %609 = vrcp.f32 %v289_v0  ;;  %v301_v3 = vand.u32 2147483648, %v289_v0  ;;  %vm295_vm0 = vweird.f32 %v289_v0  ;;  %v299_v5 = vand.u32 2147483647, %v289_v0 }
  0x3f   : > { %v302_v7 = vor.u32 1.1754944e-38, %v301_v3  ;;  %vm300_vm3 = vcmp.eq.f32.partialorder %v299_v5, 8.507059e+37 }
  0x43   : > { %v610_v1 = vpop.eup %609 }
  0x44   : > { %v291_v2 = vmul.f32 %v610_v1, %v289_v0  ;;  %vm296_vm1 = vweird.f32 %v610_v1 }
  0x45   : > { %vm297_vm2 = vmor %vm295_vm0, %vm296_vm1 }
  0x46   : > { %v292_v4 = vsub.f32 1.0, %v291_v2 }
  0x48   : > { %v293_v6 = vmul.f32 %v610_v1, %v292_v4 }
  0x4a   : > { %v294_v8 = vadd.f32 %v610_v1, %v293_v6 }
  0x4c   : > { %v298_v9 = vsel %vm297_vm2, %v610_v1, %v294_v8 }
  0x4d   : > { %v303_v10 = vsel %vm300_vm3, %v302_v7, %v298_v9 }
  0x4e   : > { %521 = vpush %v303_v10 }
  0x7f   : > { %s522_s11 = spop %521 }
  0x80   : > { %s305_s20 = smul.f32 %s522_s11, %s285_s18 }
  0x81   : > { %s309_s21 = smul.f32 %s522_s11, %s512_s14  ;;  %s385_s11 = sshll.u32 %s284_s19, 4  ;;  %s386_s11 = int_to_ptr.vmem [resolvable:$true] %s385_s11 }
  0x82   : > { %v307_v13 = vstv %s305_s20  ;;  %s387_s20 = sshll.u32 %s383_s8, 4  ;;  %s388_s20 = int_to_ptr.hbm [resolvable:$true] %s387_s20 }
  0x83   : > { %v308_v14 = vmul.f32 %v307_v13, %v306_v11  ;;  %v311_v15 = vstv %s309_s21  ;;  %s371_s21 = scalar_lea.sflag [#allocation6], %s929_s13  ;;  %s701_s30 = sshra.s32 %s388_s20, 4  ;;  %s702_s30 = int_to_ptr.hbm [resolvable:$true] %s701_s30 }
  0x84   : > { %v312_v16 = vmul.f32 %v311_v15, %v310_v12  ;;  %s703_s0 = scalar_lea.hbm %s702_s30, 4  ;;  %p708_p7 = scmp.lt.s32.totalorder %s702_s30, %s1004_s5 }
  0x85   : > { %p704_p3 = scmp.ne.s32.totalorder %s702_s30, %s703_s0  ;;  %p709_p8 = scmp.lt.s32.totalorder %s707_s9, %s703_s0 }
  0x86   : > { %v313_v17 = vadd.f32 %v312_v16, %v308_v14 }
  0x87   : > { %p705_p5 = pnand %p704_p3, %p893_p9  ;;  %p710_p10 = por %p709_p8, %p708_p7 }
  0x88   : > { %v513_v19 = vmul.f32 -1.442695, %v313_v17 }
  0x89   : > { %p706_p6 = pneg %p705_p5 }
  0x8a   : > { %611 = vpow2.f32 %v513_v19 }
  0x8b   : > { %p711_p11 = pnand %p710_p10, %p706_p6 }
  0x90   : > { %v612_v21 = vpop.eup %611 }
  0x91   : > { %v317_v22 = vadd.f32 1.0, %v612_v21 }
  0x93   : > { %613 = vrcp.f32 %v317_v22  ;;  %v329_v26 = vand.u32 2147483648, %v317_v22  ;;  %v327_v28 = vand.u32 2147483647, %v317_v22  ;;  %vm323_vm5 = vweird.f32 %v317_v22 }
  0x95   : > { %v330_v30 = vor.u32 1.1754944e-38, %v329_v26  ;;  %vm328_vm7 = vcmp.eq.f32.partialorder %v327_v28, 8.507059e+37 }
  0x99   : > { %v614_v23 = vpop.eup %613 }
  0x9a   : > { %v319_v24 = vmul.f32 %v614_v23, %v317_v22  ;;  %vm324_vm4 = vweird.f32 %v614_v23 }
  0x9b   : > { %vm325_vm6 = vmor %vm323_vm5, %vm324_vm4 }
  0x9c   : > { %v320_v25 = vsub.f32 1.0, %v319_v24 }
  0x9e   : > { %v321_v27 = vmul.f32 %v614_v23, %v320_v25 }
  0xa0   : > { %v322_v29 = vadd.f32 %v614_v23, %v321_v27 }
  0xa2   : > { %v326_v31 = vsel %vm325_vm6, %v614_v23, %v322_v29 }
  0xa3   : > { %v331_v32 = vsel %vm328_vm7, %v330_v30, %v326_v31 }
  0xa4   : > { %v333_v33 = vmul.f32 %v331_v32, %v313_v17 }
  0xa6   : > { %514 = vmatpush.msk.msra.mxu0 %vm345_vm8, %v333_v33  ;;  %v339_v35 = vpop.permute.xlu0 %338 }
  0xa7   : > { %515 = vmatmul.msk.f32.vlgmr.msra.gmra.mxu0 %vm341_vm9, %v334_v34 }
 0x124   : > { %v366_v36 = vpop.f32.mrf.mxu0 }
 0x125   : > { %v367_v37 = vadd.f32 %v366_v36, %v339_v35 }
 0x127   : > { %369 = vst [vmem:[%s284_s19] sm:$0xf] %v367_v37 }
 0x128   : > { %714 = shalt.err (!%p711_p11)
}
 0x129   : > { %527 = dma.vmem_to_hbm [thread:$0]  (%p893_p9), %s386_s11, 64, %s388_s20, %s371_s21  }
 0x12a PF: > { %p541_p13 = scmp.ge.s32.totalorder %s791_s28, 2  ;;  %s399_s13 = sand.u32 1, %s763_s22  }
 0x12b   : > { %s400_s29 = scalar_lea.sflag [#allocation6], %s399_s13 }
 0x12c   : > { %p537_p0 = pnand %p541_p13, %p899_p12 }
 0x12e   : > { %p538_p1 = pneg %p537_p0 }
 0x130   : > { %758 = dma.done.wait (%p538_p1), %s400_s29, 64  }
 0x131   : > { %760 = vsyncadd (%p538_p1), %s400_s29, 4294967232  ;;  %s32_s28 = sadd.s32 1, %s791_s28   ;;  %s1016_s12 = sld [smem:[#allocation14_spill]] }
 0x132   : > { %p29_p2 = scmp.ge.s32.totalorder %s32_s28, 6   ;;  %s1017_s1 = sld [smem:[#allocation15_spill]] }
 0x133   : > { %s1018_s22 = smov %s767_s23  ;;  %s1019_s23 = smov %s771_s24 }
 0x134   : > { %s1020_s24 = smov %s906_s17  ;;  %s1021_s25 = smov %s783_s26 }
 0x135   : > { %s1022_s0 = smov %s787_s27  ;;  %31 = sbr.rel (!%p29_p2) target bundleno = 15 (0xf), region = 94 }
 0x137   : > { %s1023_s26 = smov %s1016_s12 }
 0x138   : > { %s1024_s27 = smov %s1017_s1 }
 0x13a   :  { %406 = vsyncpa [#allocation5], 1 }
 0x13b   :  { %408 = vsyncpa [#allocation5 + $0x1], 1 }
 0x13c   :  { %409 = vsyncpa [#allocation8], 1 }
 0x13d   :  { %411 = vsyncpa [#allocation8 + $0x1], 1 }
 0x13e   :  { %412 = vsyncpa [#allocation6], 1 }
 0x13f   :  { %414 = vsyncpa [#allocation6 + $0x1], 1 }

// kernel: tpu_custom_call.1
= control target key start
LH: loop header
LB: loop body
LE: loop exit
PB: predicated region body
PF: predicated region fallthrough
CT: control target
= control target key end

     0   :  { %s793_s21 = smov [#allocation3]   ;;  %s999_s0 = inlined_call_operand.vmem [shape: f32[2], index: 0, kind: input, shape index: {}]   ;;  %s1000_s1 = inlined_call_operand.hbm [shape: f32[2,4,256], index: 1, kind: input, shape index: {}]   ;;  %s1001_s2 = inlined_call_operand.hbm [shape: f32[2,4,256], index: 2, kind: input, shape index: {}]   ;;  %s1002_s3 = inlined_call_operand.vmem [shape: f32[4,4], index: 3, kind: input, shape index: {}]   ;;  %s1003_s4 = inlined_call_operand.vmem [shape: f32[4,1], index: 4, kind: input, shape index: {}]   ;;  %s1004_s5 = inlined_call_operand.hbm [shape: f32[2,4,256], index: 5, kind: output, shape index: {}]  }
   0x1   :  { %1007 = sst [smem:[#allocation16_spill]] %s1000_s1  ;;  %s11_s20 = sshll.u32 %s999_s0, 4  ;;  %s12_s20 = int_to_ptr.vmem [resolvable:$true] %s11_s20 }
   0x2   :  { %14 = dma.vmem_to_smem %s12_s20, 16, %s793_s21, [#allocation2] }
   0x3   :  { %747 = dma.done.wait [#allocation2], 16 }
   0x4   :  { %748 = vsyncadd [#allocation2], 4294967280 }
   0x5   :  { %17 = sfence }
   0x6   :  { %18 = vsyncpa [#allocation5], 0 }
   0x7   :  { %20 = vsyncpa [#allocation5 + $0x1], 0 }
   0x8   :  { %21 = vsyncpa [#allocation8], 0 }
   0x9   :  { %23 = vsyncpa [#allocation8 + $0x1], 0 }
   0xa   :  { %24 = vsyncpa [#allocation6], 0 }
   0xb   :  { %26 = vsyncpa [#allocation6 + $0x1], 0  ;;  %s828_s22 = smov 0   ;;  %s830_s23 = smov 0  }
   0xc   :  { %s832_s24 = smov 0   ;;  %s834_s25 = smov 0  }
   0xd   :  { %s836_s0 = smov 0   ;;  %s838_s26 = smov 0  }
   0xe   :  { %s840_s27 = smov 0   ;;  %s842_s28 = smov 0  }
   0xf LB: > { %s498_s29 = sadd.s32 4294967295, %s791_s28   ;;  %s499_s30 = sadd.s32 4294967294, %s791_s28   ;;  %s791_s28 = sphi %s842_s28, %s32_s28   ;;  %s787_s27 = sphi %s840_s27, %s1024_s27   ;;  %s783_s26 = sphi %s838_s26, %s1023_s26   ;;  %s779_s0 = sphi %s836_s0, %s1022_s0   ;;  %s775_s25 = sphi %s834_s25, %s1021_s25   ;;  %s771_s24 = sphi %s832_s24, %s1020_s24   ;;  %s767_s23 = sphi %s830_s23, %s1019_s23   ;;  %s763_s22 = sphi %s828_s22, %s1018_s22  }
  0x10   : > { %s41_s6 = sadd.s32 1, %s783_s26  ;;  %s44_s7 = sadd.s32 1, %s787_s27 }
  0x11   : > { %p42_p0 = scmp.ge.s32.totalorder %s41_s6, 2  ;;  %s53_s8 = sadd.s32 1, %s771_s24 }
  0x12   : > { %p60_p1 = scmp.ne.s32.totalorder %s771_s24, %s767_s23  ;;  %p61_p2 = scmp.eq.s32.totalorder %s791_s28, 0 }
  0x13   : > { %s1026_s6 = smov (%p42_p0, %s41_s6), 0  ;;  %s1028_s7 = smov (!%p42_p0, %s44_s7), %s787_s27 }
  0x14   : > { %1008 = sst [smem:[#allocation14_spill]] %s1026_s6  ;;  %s49_s9 = ssub.s32 %s783_s26, %s1026_s6 }
  0x15   : > { %p881_p3 = por %p61_p2, %p60_p1  ;;  %p46_p4 = scmp.ge.s32.totalorder %s1028_s7, 2 }
  0x16   : > { %p66_p5 = scmp.ne.s32.totalorder %s767_s23, %s763_s22  ;;  %p67_p6 = scmp.eq.s32.totalorder %s498_s29, 0 }
  0x17   : > { %p162_p7 = scmp.eq.s32.totalorder %s498_s29, 3  ;;  %s1030_s7 = smov (%p46_p4, %s1028_s7), 0 }
  0x18   : > { %1010 = sst [smem:[#allocation15_spill]] %s1030_s7  ;;  %p889_p8 = por %p67_p6, %p66_p5 }
  0x19   : > { %p893_p9 = por %p162_p7, %p60_p1  ;;  %s48_s13 = ssub.s32 %s787_s27, %s1030_s7 }
  0x1a   : > { %p168_p10 = scmp.eq.s32.totalorder %s499_s30, 3  ;;  %s50_s14 = sor.u32 %s49_s9, %s48_s13 }
  0x1b   : > { %p51_p11 = scmp.eq.s32.totalorder %s50_s14, 0  ;;  %p540_p13 = scmp.lt.s32.totalorder %s791_s28, 4 }
  0x1c   : > { %p899_p12 = por %p168_p10, %p66_p5  ;;  %s194_s16 = sand.u32 1, %s771_s24  }
  0x1d   : > { %s906_s17 = scalar_select %p51_p11, %s771_s24, %s53_s8  }
  0x1e   : > { %s502_s18 = sshll.u32 %s194_s16, 2  ;;  %s503_s19 = sshll.u32 %s787_s27, 1 }
  0x1f   : > { %s202_s20 = sadd.s32 %s783_s26, %s503_s19  ;;  %s198_s21 = scalar_lea.vmem [#allocation4], %s502_s18 }
  0x20   : > { %s208_s29 = sshll.u32 %s198_s21, 4  ;;  %s504_s7 = sshll.u32 %s202_s20, 2  ;;  %s209_s29 = int_to_ptr.vmem [resolvable:$true] %s208_s29 }
  0x21   : > { %s1014_s1 = sld [smem:[#allocation16_spill]]  ;;  %p915_p0 = pnand %p540_p13, %p881_p3 }
  0x22   : > { %p508_p1 = scmp.ge.s32.totalorder %s791_s28, 1  ;;  %s195_s6 = scalar_lea.sflag [#allocation5], %s194_s16 }
  0x23   : > { %p234_p2 = scmp.lt.s32.totalorder %s791_s28, 5  ;;  %s225_s21 = scalar_lea.hbm %s1001_s2, %s504_s7 }
  0x24   : > { %s227_s30 = sshll.u32 %s225_s21, 4  ;;  %s219_s10 = scalar_lea.vmem [#allocation7], %s502_s18  ;;  %s228_s30 = int_to_ptr.hbm [resolvable:$true] %s227_s30 }
  0x25   : > { %p235_p4 = pnand %p508_p1, %p234_p2  ;;  %s229_s9 = sshll.u32 %s219_s10, 4  ;;  %s230_s9 = int_to_ptr.vmem [resolvable:$true] %s229_s9 }
  0x27   : > { %s204_s13 = scalar_lea.hbm %s1014_s1, %s504_s7  ;;  %s216_s1 = scalar_lea.sflag [#allocation8], %s194_s16 }
  0x28   : > { %s206_s8 = sshll.u32 %s204_s13, 4  ;;  %238 = sbr.rel (%p235_p4) target bundleno = 298 (0x12a), region = 36  ;;  %s207_s8 = int_to_ptr.hbm [resolvable:$true] %s206_s8 }
  0x29   : > { %532 = dma.hbm_to_vmem [thread:$0]  (!%p915_p0), %s207_s8, 64, %s209_s29, %s195_s6  }
  0x2a   : > { %535 = dma.hbm_to_vmem [thread:$0]  (!%p915_p0), %s228_s30, 64, %s230_s9, %s216_s1  }
  0x2b   : > { %s929_s13 = sand.u32 (!%p235_p4), 1, %s767_s23  }
  0x2c   : > { %s932_s6 = sshll.u32 (!%p235_p4), %s929_s13, 2  ;;  %s241_s7 = scalar_lea.sflag (!%p235_p4), [#allocation5], %s929_s13 }
  0x2d   : > { %s244_s29 = scalar_lea.vmem [#allocation4], %s932_s6 }
  0x2e   : > { %750 = dma.done.wait (%p889_p8), %s241_s7, 64  }
  0x2f   : > { %752 = vsyncadd (%p889_p8), %s241_s7, 4294967232  ;;  %s251_s1 = scalar_lea.sflag [#allocation8], %s929_s13  ;;  %s254_s16 = scalar_lea.vmem [#allocation7], %s932_s6 }
  0x30   : > { %754 = dma.done.wait (%p889_p8), %s251_s1, 64  }
  0x31   : > { %756 = vsyncadd (%p889_p8), %s251_s1, 4294967232  ;;  %s285_s18 = sld [smem:[#allocation3]]  ;;  %v306_v11 = vld [vmem:[%s244_s29] sm:$0xf]  ;;  %v310_v12 = vld [vmem:[%s254_s16] sm:$0xf] }
  0x32   : > { %s512_s14 = sld [smem:[#allocation3 + $0x1]]  ;;  %v335_v18 = vld [vmem:[%s1003_s4] sm:$0xf]  ;;  %v794_v20 = vmov 0   ;;  %vm345_vm8 = vcmask 1043456   ;;  %vm341_vm9 = vcmask 31744  }
  0x33   : > { %608 = vset.pattern.permute.xlu0 %v794_v20  ;;  %v334_v34 = vld [vmem:[%s1002_s3] sm:$0xf]  ;;  %s517_s29 = sshll.u32 %s779_s0, 1  ;;  %s707_s9 = scalar_lea.hbm %s1004_s5, 16 }
  0x34   : > { %338 = vperm.xlu0 %608, %v335_v18   ;;  %s381_s1 = sadd.s32 %s775_s25, %s517_s29 }
  0x35   : > { %s518_s16 = sshll.u32 %s381_s1, 2 }
  0x38   : > { %s287_s8 = sadd.f32 %s512_s14, %s285_s18 }
  0x3a   : > { %s288_s19 = sadd.f32 0.0001, %s287_s8  ;;  %s383_s8 = scalar_lea.hbm %s1004_s5, %s518_s16 }
  0x3c   : > { %v289_v0 = vstv %s288_s19  ;;  %s284_s19 = scalar_lea.vmem [#allocation9], %s932_s6 }
  0x3d   : > { %609 = vrcp.f32 %v289_v0  ;;  %v301_v3 = vand.u32 2147483648, %v289_v0  ;;  %vm295_vm0 = vweird.f32 %v289_v0  ;;  %v299_v5 = vand.u32 2147483647, %v289_v0 }
  0x3f   : > { %v302_v7 = vor.u32 1.1754944e-38, %v301_v3  ;;  %vm300_vm3 = vcmp.eq.f32.partialorder %v299_v5, 8.507059e+37 }
  0x43   : > { %v610_v1 = vpop.eup %609 }
  0x44   : > { %v291_v2 = vmul.f32 %v610_v1, %v289_v0  ;;  %vm296_vm1 = vweird.f32 %v610_v1 }
  0x45   : > { %vm297_vm2 = vmor %vm295_vm0, %vm296_vm1 }
  0x46   : > { %v292_v4 = vsub.f32 1.0, %v291_v2 }
  0x48   : > { %v293_v6 = vmul.f32 %v610_v1, %v292_v4 }
  0x4a   : > { %v294_v8 = vadd.f32 %v610_v1, %v293_v6 }
  0x4c   : > { %v298_v9 = vsel %vm297_vm2, %v610_v1, %v294_v8 }
  0x4d   : > { %v303_v10 = vsel %vm300_vm3, %v302_v7, %v298_v9 }
  0x4e   : > { %521 = vpush %v303_v10 }
  0x7f   : > { %s522_s11 = spop %521 }
  0x80   : > { %s305_s20 = smul.f32 %s522_s11, %s285_s18 }
  0x81   : > { %s309_s21 = smul.f32 %s522_s11, %s512_s14  ;;  %s385_s11 = sshll.u32 %s284_s19, 4  ;;  %s386_s11 = int_to_ptr.vmem [resolvable:$true] %s385_s11 }
  0x82   : > { %v307_v13 = vstv %s305_s20  ;;  %s387_s20 = sshll.u32 %s383_s8, 4  ;;  %s388_s20 = int_to_ptr.hbm [resolvable:$true] %s387_s20 }
  0x83   : > { %v308_v14 = vmul.f32 %v307_v13, %v306_v11  ;;  %v311_v15 = vstv %s309_s21  ;;  %s371_s21 = scalar_lea.sflag [#allocation6], %s929_s13  ;;  %s701_s30 = sshra.s32 %s388_s20, 4  ;;  %s702_s30 = int_to_ptr.hbm [resolvable:$true] %s701_s30 }
  0x84   : > { %v312_v16 = vmul.f32 %v311_v15, %v310_v12  ;;  %s703_s0 = scalar_lea.hbm %s702_s30, 4  ;;  %p708_p7 = scmp.lt.s32.totalorder %s702_s30, %s1004_s5 }
  0x85   : > { %p704_p3 = scmp.ne.s32.totalorder %s702_s30, %s703_s0  ;;  %p709_p8 = scmp.lt.s32.totalorder %s707_s9, %s703_s0 }
  0x86   : > { %v313_v17 = vadd.f32 %v312_v16, %v308_v14 }
  0x87   : > { %p705_p5 = pnand %p704_p3, %p893_p9  ;;  %p710_p10 = por %p709_p8, %p708_p7 }
  0x88   : > { %v513_v19 = vmul.f32 -1.442695, %v313_v17 }
  0x89   : > { %p706_p6 = pneg %p705_p5 }
  0x8a   : > { %611 = vpow2.f32 %v513_v19 }
  0x8b   : > { %p711_p11 = pnand %p710_p10, %p706_p6 }
  0x90   : > { %v612_v21 = vpop.eup %611 }
  0x91   : > { %v317_v22 = vadd.f32 1.0, %v612_v21 }
  0x93   : > { %613 = vrcp.f32 %v317_v22  ;;  %v329_v26 = vand.u32 2147483648, %v317_v22  ;;  %v327_v28 = vand.u32 2147483647, %v317_v22  ;;  %vm323_vm5 = vweird.f32 %v317_v22 }
  0x95   : > { %v330_v30 = vor.u32 1.1754944e-38, %v329_v26  ;;  %vm328_vm7 = vcmp.eq.f32.partialorder %v327_v28, 8.507059e+37 }
  0x99   : > { %v614_v23 = vpop.eup %613 }
  0x9a   : > { %v319_v24 = vmul.f32 %v614_v23, %v317_v22  ;;  %vm324_vm4 = vweird.f32 %v614_v23 }
  0x9b   : > { %vm325_vm6 = vmor %vm323_vm5, %vm324_vm4 }
  0x9c   : > { %v320_v25 = vsub.f32 1.0, %v319_v24 }
  0x9e   : > { %v321_v27 = vmul.f32 %v614_v23, %v320_v25 }
  0xa0   : > { %v322_v29 = vadd.f32 %v614_v23, %v321_v27 }
  0xa2   : > { %v326_v31 = vsel %vm325_vm6, %v614_v23, %v322_v29 }
  0xa3   : > { %v331_v32 = vsel %vm328_vm7, %v330_v30, %v326_v31 }
  0xa4   : > { %v333_v33 = vmul.f32 %v331_v32, %v313_v17 }
  0xa6   : > { %514 = vmatpush.msk.msra.mxu0 %vm345_vm8, %v333_v33  ;;  %v339_v35 = vpop.permute.xlu0 %338 }
  0xa7   : > { %515 = vmatmul.msk.f32.vlgmr.msra.gmra.mxu0 %vm341_vm9, %v334_v34 }
 0x124   : > { %v366_v36 = vpop.f32.mrf.mxu0 }
 0x125   : > { %v367_v37 = vadd.f32 %v366_v36, %v339_v35 }
 0x127   : > { %369 = vst [vmem:[%s284_s19] sm:$0xf] %v367_v37 }
 0x128   : > { %714 = shalt.err (!%p711_p11)
}
 0x129   : > { %527 = dma.vmem_to_hbm [thread:$0]  (%p893_p9), %s386_s11, 64, %s388_s20, %s371_s21  }
 0x12a PF: > { %p541_p13 = scmp.ge.s32.totalorder %s791_s28, 2  ;;  %s399_s13 = sand.u32 1, %s763_s22  }
 0x12b   : > { %s400_s29 = scalar_lea.sflag [#allocation6], %s399_s13 }
 0x12c   : > { %p537_p0 = pnand %p541_p13, %p899_p12 }
 0x12e   : > { %p538_p1 = pneg %p537_p0 }
 0x130   : > { %758 = dma.done.wait (%p538_p1), %s400_s29, 64  }
 0x131   : > { %760 = vsyncadd (%p538_p1), %s400_s29, 4294967232  ;;  %s32_s28 = sadd.s32 1, %s791_s28   ;;  %s1016_s12 = sld [smem:[#allocation14_spill]] }
 0x132   : > { %p29_p2 = scmp.ge.s32.totalorder %s32_s28, 6   ;;  %s1017_s1 = sld [smem:[#allocation15_spill]] }
 0x133   : > { %s1018_s22 = smov %s767_s23  ;;  %s1019_s23 = smov %s771_s24 }
 0x134   : > { %s1020_s24 = smov %s906_s17  ;;  %s1021_s25 = smov %s783_s26 }
 0x135   : > { %s1022_s0 = smov %s787_s27  ;;  %31 = sbr.rel (!%p29_p2) target bundleno = 15 (0xf), region = 94 }
 0x137   : > { %s1023_s26 = smov %s1016_s12 }
 0x138   : > { %s1024_s27 = smov %s1017_s1 }
 0x13a   :  { %406 = vsyncpa [#allocation5], 1 }
 0x13b   :  { %408 = vsyncpa [#allocation5 + $0x1], 1 }
 0x13c   :  { %409 = vsyncpa [#allocation8], 1 }
 0x13d   :  { %411 = vsyncpa [#allocation8 + $0x1], 1 }
 0x13e   :  { %412 = vsyncpa [#allocation6], 1 }
 0x13f   :  { %414 = vsyncpa [#allocation6 + $0x1], 1 }

</bundles_post_ra>
